<compile_context>
chip_gen: v7x
topology: tpu7x:2x2x1
jax: 0.10.0
libtpu: 0.0.40
codegen_flags: <defaults>
</compile_context>

<pallas_src>
import functools
import math

import jax
import jax.numpy as jnp
import numpy as np
from jax.experimental import pallas as pl
from jax.experimental.pallas import tpu as pltpu

_LANES = 128
_SUBLANES = 8


def _lcm(a: int, b: int) -> int:
    return a * b // math.gcd(a, b)


def _round_up(n: int, m: int) -> int:
    return -(-n // m) * m


def _pe_kernel(const_ref, o_ref, *, chunk_rows, seg_chunks, segs_per_block,
               pos_per_seg, pos_per_block):
    """Writes one (block_rows, 128) lane-dense slab of the PE table.

    const_ref : (5, chunk_rows, 128) f32, constant across the grid:
        [0] div pattern (per-lane frequency)
        [1] local position offsets within a chunk
        [2] cos(pos_per_chunk * div)   (rotation, angle computed in f64)
        [3] sin(pos_per_chunk * div)
        [4] 1.0 on odd (cos) columns, 0.0 on even (sin) columns
    """
    div = const_ref[0]
    posl = const_ref[1]
    rot_c = const_ref[2]
    rot_s = const_ref[3]
    is_cos = const_ref[4] != 0.0

    block_pos0 = pl.program_id(0) * pos_per_block

    def seg_body(s, carry):
        # Exact seed: integer positions are exact in f32 (asserted < 2^24 in
        # the wrapper); (seg_pos0 + posl) is an exact f32 sum, so theta has a
        # single rounding, same as the PyTorch reference.
        seg_pos0 = (block_pos0 + s * pos_per_seg).astype(jnp.float32)
        theta = (seg_pos0 + posl) * div
        s_cur = jnp.sin(theta)
        c_cur = jnp.cos(theta)
        row0 = s * (seg_chunks * chunk_rows)

        def chunk_body(t, sc):
            s_v, c_v = sc
            off = pl.multiple_of(row0 + t * chunk_rows, _SUBLANES)
            o_ref[pl.ds(off, chunk_rows), :] = jnp.where(is_cos, c_v, s_v)
            s_n = s_v * rot_c + c_v * rot_s
            c_n = c_v * rot_c - s_v * rot_s
            return (s_n, c_n)

        jax.lax.fori_loop(0, seg_chunks, chunk_body, (s_cur, c_cur),
                          unroll=True)
        return carry

    jax.lax.fori_loop(0, segs_per_block, seg_body, 0)


def positional_embedding(x: jax.Array, d_model: int,
                         max_len: int = 1000) -> jax.Array:
    """Returns pe[:, :seq_len] of shape (1, seq_len, d_model), float32."""
    seq_len = int(x.shape[1])
    assert d_model % 2 == 0, "PositionalEmbedding requires even d_model"
    assert 1 <= seq_len <= max_len

    # ---- lane-dense flat layout parameters (works for any even d_model) ----
    g = math.gcd(d_model, _LANES)
    k_flat = d_model // g                      # flat rows per pattern period
    chunk_rows = _lcm(_SUBLANES, k_flat)       # rows per recurrence step
    pos_per_chunk = chunk_rows * _LANES // d_model

    padded_seq = _round_up(seq_len, pos_per_chunk)
    assert padded_seq < (1 << 24), "positions must stay exact in float32"
    n_flat = padded_seq * d_model // _LANES    # multiple of chunk_rows
    n_chunks = n_flat // chunk_rows

    # ---- block sizing: ~2 MiB blocks, multiple of a reseed segment, ----
    # ---- never larger than the array, aim for ~8 grid steps (>=2 for v7x) --
    seg_chunks = min(16, n_chunks)             # reseed period (bounds drift)
    chunk_bytes = chunk_rows * _LANES * 4
    max_segs_budget = max(1, (2 << 20) // (chunk_bytes * seg_chunks))
    max_segs_fit = n_chunks // seg_chunks      # keeps block <= array rows
    target_segs = -(-max_segs_fit // 8)        # ~8 grid steps when possible
    segs_per_block = max(1, min(max_segs_budget, max_segs_fit, target_segs))

    block_rows = segs_per_block * seg_chunks * chunk_rows
    pos_per_seg = seg_chunks * pos_per_chunk
    pos_per_block = segs_per_block * pos_per_seg
    grid = (pl.cdiv(n_chunks, segs_per_block * seg_chunks),)

    # ---- host-side constants (tiny: 5 x chunk_rows x 128 f32) ----
    scale = -math.log(10000.0) / d_model
    div_half = np.exp(np.arange(0, d_model, 2, dtype=np.float32)
                      * np.float32(scale)).astype(np.float32)
    div_full = np.repeat(div_half, 2)                       # per-column freq
    f = np.arange(chunk_rows * _LANES).reshape(chunk_rows, _LANES)
    col = f % d_model
    posl = (f // d_model).astype(np.float32)
    div_pat = div_full[col].astype(np.float32)
    # Rotation per chunk step; keep the angle in f64 so the recurrence does
    # not accumulate phase error, then round the values once to f32.
    ang = np.float64(pos_per_chunk) * div_pat.astype(np.float64)
    rot_c = np.cos(ang).astype(np.float32)
    rot_s = np.sin(ang).astype(np.float32)
    is_cos = (col % 2 == 1).astype(np.float32)
    const = jnp.asarray(np.stack([div_pat, posl, rot_c, rot_s, is_cos]))

    flat = pl.pallas_call(
        functools.partial(
            _pe_kernel,
            chunk_rows=chunk_rows,
            seg_chunks=seg_chunks,
            segs_per_block=segs_per_block,
            pos_per_seg=pos_per_seg,
            pos_per_block=pos_per_block,
        ),
        out_shape=jax.ShapeDtypeStruct((n_flat, _LANES), jnp.float32),
        grid=grid,
        in_specs=[pl.BlockSpec((5, chunk_rows, _LANES), lambda i: (0, 0, 0))],
        out_specs=pl.BlockSpec((block_rows, _LANES), lambda i: (i, 0)),
        compiler_params=pltpu.CompilerParams(
            dimension_semantics=("parallel",),
            vmem_limit_bytes=32 * 1024 * 1024,
        ),
    )(const)

    pe = flat.reshape(padded_seq, d_model)      # contiguous reshape (free)
    if padded_seq != seq_len:
        # TODO(synk): ragged tail costs one extra copy of the kept rows; only
        # triggers when seq_len is not a multiple of pos_per_chunk.
        pe = pe[:seq_len]
    return pe[None, :, :]


def _reference(seq_len: int, d_model: int) -> jax.Array:
    position = jnp.arange(seq_len, dtype=jnp.float32)[:, None]
    div_term = jnp.exp(jnp.arange(0, d_model, 2, dtype=jnp.float32)
                       * -(math.log(10000.0) / d_model))
    pe = jnp.zeros((seq_len, d_model), jnp.float32)
    pe = pe.at[:, 0::2].set(jnp.sin(position * div_term))
    pe = pe.at[:, 1::2].set(jnp.cos(position * div_term))
    return pe[None, :, :]


if __name__ == "__main__":
    key = jax.random.PRNGKey(0)

    # Case 1: small d_model (several positions packed per 128-lane row).
    b, s, d = 2, 8, 32
    x = jax.random.normal(key, (b, s, d), dtype=jnp.float32)
    out = jax.block_until_ready(positional_embedding(x, d))
    ref = _reference(s, d)
    assert out.shape == (1, s, d) and out.dtype == jnp.float32
    assert jnp.allclose(out, ref, atol=1e-5, rtol=0.0), \
        float(jnp.max(jnp.abs(out - ref)))

    # Case 2: d_model a multiple of 128 (direct layout, 2-chunk recurrence).
    b2, s2, d2 = 2, 16, 128
    x2 = jax.random.normal(key, (b2, s2, d2), dtype=jnp.float32)
    out2 = jax.block_until_ready(positional_embedding(x2, d2))
    ref2 = _reference(s2, d2)
    assert out2.shape == (1, s2, d2) and out2.dtype == jnp.float32
    assert jnp.allclose(out2, ref2, atol=1e-5, rtol=0.0), \
        float(jnp.max(jnp.abs(out2 - ref2)))

    # Case 3: awkward d_model (neither divisor nor multiple of 128) at the
    # module's default max_len: general lane-dense path, multi-segment
    # reseeding, ragged tail and a 2-step grid (megacore-shardable).
    s3, d3 = 1000, 96
    x3 = jax.random.normal(key, (2, s3, d3), dtype=jnp.float32)
    out3 = jax.block_until_ready(positional_embedding(x3, d3, max_len=1000))
    ref3 = _reference(s3, d3)
    assert out3.shape == (1, s3, d3) and out3.dtype == jnp.float32
    # At pos ~ 1000 the f32 rounding of the angle itself limits agreement of
    # ANY f32 implementation (incl. PyTorch) to ~1e-4; allow 2e-3 headroom.
    assert jnp.allclose(out3, ref3, atol=2e-3, rtol=0.0), \
        float(jnp.max(jnp.abs(out3 - ref3)))

    print("KERNEL_OK")
</pallas_src>

<mosaic_0001>
module attributes {stable_mosaic.version = 11 : i64} {
  func.func @_pe_kernel(%arg0: i32, %arg1: memref<5x8x128xf32, #tpu.memory_space<vmem>>, %arg2: memref<8x128xf32, #tpu.memory_space<vmem>>) attributes {dimension_semantics = [#tpu.dimension_semantics<parallel>], iteration_bounds = array<i64: 1>, scalar_prefetch = 0 : i64, scratch_operands = 0 : i64, tpu.core_type = #tpu.core_type<tc>, window_params = [{pipeline_mode = #tpu.pipeline_mode<synchronous>, transform_indices = @transform_0, window_bounds = array<i64: 5, 8, 128>}, {transform_indices = @transform_1, window_bounds = array<i64: 8, 128>}]} {
    %c0 = arith.constant 0 : index
    %c0_0 = arith.constant 0 : index
    %c0_1 = arith.constant 0 : index
    %0 = vector.load %arg1[%c0, %c0_0, %c0_1] : memref<5x8x128xf32, #tpu.memory_space<vmem>>, vector<1x8x128xf32>
    %1 = vector.shape_cast %0 : vector<1x8x128xf32> to vector<8x128xf32>
    %c1 = arith.constant 1 : index
    %c0_2 = arith.constant 0 : index
    %c0_3 = arith.constant 0 : index
    %2 = vector.load %arg1[%c1, %c0_2, %c0_3] : memref<5x8x128xf32, #tpu.memory_space<vmem>>, vector<1x8x128xf32>
    %3 = vector.shape_cast %2 : vector<1x8x128xf32> to vector<8x128xf32>
    %c2 = arith.constant 2 : index
    %c0_4 = arith.constant 0 : index
    %c0_5 = arith.constant 0 : index
    %4 = vector.load %arg1[%c2, %c0_4, %c0_5] : memref<5x8x128xf32, #tpu.memory_space<vmem>>, vector<1x8x128xf32>
    %5 = vector.shape_cast %4 : vector<1x8x128xf32> to vector<8x128xf32>
    %c3 = arith.constant 3 : index
    %c0_6 = arith.constant 0 : index
    %c0_7 = arith.constant 0 : index
    %6 = vector.load %arg1[%c3, %c0_6, %c0_7] : memref<5x8x128xf32, #tpu.memory_space<vmem>>, vector<1x8x128xf32>
    %7 = vector.shape_cast %6 : vector<1x8x128xf32> to vector<8x128xf32>
    %c4 = arith.constant 4 : index
    %c0_8 = arith.constant 0 : index
    %c0_9 = arith.constant 0 : index
    %8 = vector.load %arg1[%c4, %c0_8, %c0_9] : memref<5x8x128xf32, #tpu.memory_space<vmem>>, vector<1x8x128xf32>
    %9 = vector.shape_cast %8 : vector<1x8x128xf32> to vector<8x128xf32>
    %cst = arith.constant 0.000000e+00 : f32
    %10 = vector.broadcast %cst : f32 to vector<8x128xf32>
    %11 = arith.cmpf one, %9, %10 : vector<8x128xf32>
    %c32_i32 = arith.constant 32 : i32
    %12 = arith.muli %arg0, %c32_i32 : i32
    %c0_i32 = arith.constant 0 : i32
    %c32_i32_10 = arith.constant 32 : i32
    %13 = arith.muli %c0_i32, %c32_i32_10 : i32
    %14 = arith.addi %12, %13 : i32
    %15 = arith.sitofp %14 : i32 to f32
    %16 = vector.broadcast %15 : f32 to vector<8x128xf32>
    %17 = arith.addf %16, %3 : vector<8x128xf32>
    %18 = arith.mulf %17, %1 : vector<8x128xf32>
    %19 = math.sin %18 : vector<8x128xf32>
    %20 = math.cos %18 : vector<8x128xf32>
    %c8_i32 = arith.constant 8 : i32
    %21 = arith.muli %c0_i32, %c8_i32 : i32
    %c0_i32_11 = arith.constant 0 : i32
    %c8_i32_12 = arith.constant 8 : i32
    %22 = arith.muli %c0_i32_11, %c8_i32_12 : i32
    %23 = arith.addi %21, %22 : i32
    %24 = tpu.assume_multiple %23, 8 : i32
    %25 = arith.select %11, %20, %19 : vector<8x128xi1>, vector<8x128xf32>
    %26 = arith.index_cast %24 : i32 to index
    %c0_13 = arith.constant 0 : index
    %27 = vector.load %arg2[%26, %c0_13] : memref<8x128xf32, #tpu.memory_space<vmem>>, vector<8x128xf32>
    tpu.vector_store %arg2[%26, %c0_13], %25 {strides = array<i32>} : memref<8x128xf32, #tpu.memory_space<vmem>>, vector<8x128xf32>,
    %28 = arith.mulf %19, %5 : vector<8x128xf32>
    %29 = arith.mulf %20, %7 : vector<8x128xf32>
    %30 = arith.addf %28, %29 : vector<8x128xf32>
    %31 = arith.mulf %20, %5 : vector<8x128xf32>
    %32 = arith.mulf %19, %7 : vector<8x128xf32>
    %33 = arith.subf %31, %32 : vector<8x128xf32>
    %c1_i32 = arith.constant 1 : i32
    %c1_i32_14 = arith.constant 1 : i32
    return
  }
  func.func @transform_0(%arg0: i32) -> (i32, i32, i32) {
    %c0_i32 = arith.constant 0 : i32
    %c0_i32_0 = arith.constant 0 : i32
    %c0_i32_1 = arith.constant 0 : i32
    %c0_i32_2 = arith.constant 0 : i32
    return %c0_i32, %c0_i32_0, %c0_i32_1 : i32, i32, i32
  }
  func.func @transform_1(%arg0: i32) -> (i32, i32) {
    %c0_i32 = arith.constant 0 : i32
    %c0_i32_0 = arith.constant 0 : i32
    return %arg0, %c0_i32 : i32, i32
  }
}

</mosaic_0001>

<bundles_post_ra>
// kernel: tpu_custom_call.1
= control target key start
LH: loop header
LB: loop body
LE: loop exit
PB: predicated region body
PF: predicated region fallthrough
CT: control target
= control target key end

     0   :  { %6 = vsyncpa [#allocation3], 0  ;;  %s397_s0 = inlined_call_operand.hbm [shape: f32[5,8,128], index: 0, kind: input, shape index: {}]   ;;  %s398_s1 = inlined_call_operand.hbm [shape: f32[8,128], index: 1, kind: output, shape index: {}]  }
   0x1   :  { %7 = vsyncpa [#allocation4], 0  ;;  %s332_s6 = smov [#allocation2]   ;;  %s284_s10 = scalar_lea.hbm %s397_s0, 640 }
   0x2   :  { %s13_s7 = sshll.u32 %s332_s6, 4  ;;  %p285_p0 = scmp.ne.s32.totalorder %s397_s0, %s284_s10  ;;  %s14_s7 = int_to_ptr.vmem [resolvable:$true] %s13_s7 }
   0x3   :  { %p288_p1 = scmp.lt.u32.totalorder %s284_s10, %s397_s0 }
   0x5   :  { %p290_p2 = pnand %p288_p1, %p285_p0 }
   0x7   :  { %293 = shalt.err (!%p290_p2)
}
   0x8   :  { %s294_s15 = scalar_lea.vmem %s14_s7, 640  ;;  %p299_p4 = scmp.lt.s32.totalorder %s14_s7, %s14_s7 }
   0x9   :  { %p295_p3 = scmp.ne.s32.totalorder %s14_s7, %s294_s15  ;;  %p300_p5 = scmp.lt.s32.totalorder %s294_s15, %s294_s15 }
   0xb   :  { %p301_p6 = por %p300_p5, %p299_p4 }
   0xd   :  { %p302_p7 = pnand %p301_p6, %p295_p3 }
   0xf   :  { %305 = shalt.err (!%p302_p7)
}
  0x10   :  { %s333_s16 = smov 128   ;;  %s334_s17 = smov 8  }
  0x11   :  { %19 = dma.hbm_to_vmem [thread:$0]  %s397_s0, 640, %s14_s7, [#allocation3], %s333_s16, %s333_s16, %s334_s17  }
  0x12   :  { %328 = dma.done.wait [#allocation3], 640  }
  0x13   :  { %329 = vsyncadd [#allocation3], 4294966656  ;;  %v23_v0 = vld [vmem:[#allocation2] sm:$0xff]  ;;  %v25_v1 = vld [vmem:[#allocation2 + $0x8] sm:$0xff]  ;;  %v335_v14 = vmov 683565275  }
  0x14   :  { %v364_v2 = vmul.f32 %v25_v1, %v23_v0  ;;  %v336_v16 = vmov 2475754826   ;;  %v337_v18 = vmov 2131351028   ;;  %v338_v20 = vmov 2102212464  }
  0x15   :  { %v339_v22 = vmov 920167782   ;;  %v340_v29 = vmov 1326507024   ;;  %s341_s0 = smov [#allocation5]  }
  0x16   :  { %v37_v3 = vand.u32 2139095040, %v364_v2  ;;  %v34_v5 = vand.u32 2147483647, %v364_v2  ;;  %vm36_vm7 = vcmp.lt.s32.totalorder %v364_v2, 0  ;;  %vm126_vm15 = vweird.f32 %v364_v2  ;;  %s249_s20 = sshll.u32 %s341_s0, 4  ;;  %s250_s20 = int_to_ptr.vmem [resolvable:$true] %s249_s20 }
  0x17   :  { %s306_s21 = scalar_lea.vmem %s250_s20, 128  ;;  %p311_p9 = scmp.lt.s32.totalorder %s250_s20, %s250_s20 }
  0x18   :  { %v38_v4 = vshrl.u32 %v37_v3, 23  ;;  %v41_v8 = vand.u32 8388607, %v34_v5  ;;  %vm35_vm8 = vcmp.le.f32.partialorder %v34_v5, 0.7853982  ;;  %p307_p8 = scmp.ne.s32.totalorder %s250_s20, %s306_s21  ;;  %p312_p10 = scmp.lt.s32.totalorder %s306_s21, %s306_s21 }
  0x1a   :  { %v258_v6 = vadd.s32 4294967169, %v38_v4  ;;  %v42_v11 = vor.u32 8388608, %v41_v8  ;;  %p313_p11 = por %p312_p10, %p311_p9 }
  0x1c   :  { %v44_v7 = vadd.s32 1, %v258_v6  ;;  %v82_v31 = vshll.u32 %v42_v11, 8  ;;  %p314_p12 = pnand %p313_p11, %p307_p8 }
  0x1e   :  { %vm45_vm0 = vcmp.gt.s32.totalorder %v44_v7, 0 }
  0x1f   :  { %v46_v9 = vsel %vm45_vm0, %v44_v7, 0 }
  0x20   :  { %v48_v10 = vand.u32 31, %v46_v9  ;;  %v47_v12 = vshrl.u32 %v46_v9, 5 }
  0x22   :  { %v49_v13 = vsub.s32 32, %v48_v10  ;;  %v51_v15 = vshll.u32 %v335_v14, %v48_v10  ;;  %v54_v17 = vshll.u32 %v336_v16, %v48_v10  ;;  %v57_v19 = vshll.u32 %v337_v18, %v48_v10 }
  0x23   :  { %v60_v21 = vshll.u32 %v338_v20, %v48_v10  ;;  %v63_v23 = vshll.u32 %v339_v22, %v48_v10  ;;  %vm66_vm1 = vcmp.lt.s32.totalorder %v47_v12, 1  ;;  %vm69_vm2 = vcmp.lt.s32.totalorder %v47_v12, 4 }
  0x24   :  { %v50_v24 = vshrl.u32 %v335_v14, %v49_v13  ;;  %v52_v25 = vshrl.u32 %v336_v16, %v49_v13  ;;  %v55_v26 = vshrl.u32 %v337_v18, %v49_v13  ;;  %v58_v27 = vshrl.u32 %v338_v20, %v49_v13 }
  0x25   :  { %v61_v28 = vshrl.u32 %v339_v22, %v49_v13  ;;  %v64_v30 = vshrl.u32 %v340_v29, %v49_v13  ;;  %vm67_vm3 = vcmp.lt.s32.totalorder %v47_v12, 2  ;;  %vm68_vm4 = vcmp.lt.s32.totalorder %v47_v12, 3 }
  0x26   :  { %v53_v32 = vor.u32 %v52_v25, %v51_v15  ;;  %v56_v33 = vor.u32 %v55_v26, %v54_v17  ;;  %v59_v34 = vor.u32 %v58_v27, %v57_v19  ;;  %v27_v27 = vld [vmem:[#allocation2 + $0x20] sm:$0xff] }
  0x27   :  { %v62_v35 = vor.u32 %v61_v28, %v60_v21  ;;  %v65_v36 = vor.u32 %v64_v30, %v63_v23  ;;  %vm28_vm0 = vcmp.ne.f32.partialorder %v27_v27, 0.0 }
  0x28   :  { %v70_v37 = vsel %vm66_vm1, %v50_v24, %v53_v32  ;;  %v71_v38 = vsel %vm69_vm2, %v59_v34, 2102212464  ;;  %v74_v39 = vsel %vm66_vm1, %v53_v32, %v56_v33  ;;  %v78_v40 = vsel %vm66_vm1, %v56_v33, %v59_v34 }
  0x29   :  { %v72_v41 = vsel %vm68_vm4, %v56_v33, %v71_v38  ;;  %v75_v42 = vsel %vm69_vm2, %v62_v35, 920167782  ;;  %v79_v43 = vsel %vm69_vm2, %v65_v36, 1326507024 }
  0x2a   :  { %v76_v44 = vsel %vm68_vm4, %v59_v34, %v75_v42  ;;  %v80_v45 = vsel %vm68_vm4, %v62_v35, %v79_v43  ;;  %v73_v46 = vsel %vm67_vm3, %v70_v37, %v72_v41 }
  0x2b   :  { %v77_v47 = vsel %vm67_vm3, %v74_v39, %v76_v44  ;;  %v81_v48 = vsel %vm67_vm3, %v78_v40, %v80_v45  ;;  %v89_v53 = vmul.u32 %v82_v31, %v73_v46 }
  0x2c   :  { %v370_v49 = vmul.u32.u64.low %v82_v31, %v81_v48  ;;  %v371_v50 = vmul.u32.u64.high %v82_v31, %v81_v48, %v370_v49  ;;  %v373_v51 = vmul.u32.u64.low %v82_v31, %v77_v47  ;;  %v374_v52 = vmul.u32.u64.high %v82_v31, %v77_v47, %v373_v51 }
  0x2e   :  { %vm91_vm5 = vc.u32 %v371_v50, %v373_v51  ;;  %v92_v54 = vadd.s32 1, %v374_v52  ;;  %v90_v1 = vadd.s32 %v373_v51, %v371_v50 }
  0x30   :  { %v93_v55 = vsel %vm91_vm5, %v92_v54, %v374_v52 }
  0x31   :  { %v94_v56 = vadd.s32 %v93_v55, %v89_v53 }
  0x33   :  { %v95_v57 = vadd.s32 536870912, %v94_v56 }
  0x35   :  { %v96_v58 = vshrl.u32 %v95_v57, 30 }
  0x37   :  { %v97_v59 = vshll.u32 %v96_v58, 30  ;;  %v120_v15 = vsub.s32 4, %v96_v58 }
  0x39   :  { %v98_v60 = vsub.s32 %v94_v56, %v97_v59  ;;  %v121_v18 = vsel %vm36_vm7, %v120_v15, %v96_v58 }
  0x3a   :  { %v123_v21 = vsel %vm35_vm8, 0, %v121_v18 }
  0x3b   :  { %v100_v61 = vsub.s32 0, %v98_v60  ;;  %v127_v22 = vadd.s32 3, %v123_v21  ;;  %v231_v24 = vand.u32 3, %v123_v21 }
  0x3d   :  { %v259_v62 = vmin.u32 %v100_v61, %v98_v60  ;;  %v128_v23 = vand.u32 3, %v127_v22  ;;  %vm236_vm10 = vcmp.eq.s32.totalorder %v231_v24, 2  ;;  %vm233_vm12 = vcmp.eq.s32.totalorder %v231_v24, 0 }
  0x3e   :  { %vm232_vm14 = vcmp.lt.s32.totalorder %v231_v24, 2 }
  0x3f   :  { %v102_v63 = vclz %v259_v62  ;;  %vm133_vm9 = vcmp.eq.s32.totalorder %v128_v23, 2  ;;  %vm130_vm11 = vcmp.eq.s32.totalorder %v128_v23, 0  ;;  %vm129_vm13 = vcmp.lt.s32.totalorder %v128_v23, 2 }
  0x41   :  { %v260_v0 = vadd.s32 4294967294, %v102_v63 }
  0x43   :  { %vm261_vm6 = vcmp.lt.s32.totalorder %v260_v0, 0 }
  0x44   :  { %v105_v3 = vsel %vm261_vm6, 0, %v260_v0 }
  0x45   :  { %v106_v4 = vsub.s32 32, %v105_v3  ;;  %v107_v6 = vshll.u32 %v98_v60, %v105_v3  ;;  %v110_v7 = vsub.s32 4294967266, %v105_v3 }
  0x47   :  { %v108_v8 = vshrl.u32 %v90_v1, %v106_v4  ;;  %v111_v9 = vadd.s32 127, %v110_v7 }
  0x49   :  { %v109_v10 = vor.u32 %v108_v8, %v107_v6  ;;  %v112_v11 = vshll.u32 %v111_v9, 23 }
  0x4b   :  { %v113_v12 = vor.u32 4788187, %v112_v11  ;;  %v116_v13 = vcvt.s32.f32 %v109_v10 }
  0x4d   :  { %v114_v14 = vand.u32 2147483647, %v113_v12 }
  0x4f   :  { %v117_v16 = vmul.f32 %v116_v13, %v114_v14 }
  0x51   :  { %v118_v17 = vxor.u32 2147483648, %v117_v16 }
  0x53   :  { %v119_v19 = vsel %vm36_vm7, %v118_v17, %v117_v16 }
  0x54   :  { %v122_v20 = vsel %vm35_vm8, %v364_v2, %v119_v19 }
  0x55   :  { %280 = vcosq.f32 %v122_v20 }
  0x56   :  { %282 = vsinq.f32 %v122_v20 }
  0x5f   :  { %v281_v25 = vpop.eup %280 }
  0x60   :  { %v283_v26 = vpop.eup %282  ;;  %v134_v28 = vxor.u32 2147483648, %v281_v25 }
  0x61   :  { %v131_v5 = vxor.u32 2147483648, %v283_v26 }
  0x62   :  { %v135_v29 = vsel %vm133_vm9, %v134_v28, %v283_v26  ;;  %v238_v30 = vsel %vm236_vm10, %v134_v28, %v283_v26 }
  0x63   :  { %v132_v31 = vsel %vm130_vm11, %v281_v25, %v131_v5  ;;  %v235_v32 = vsel %vm233_vm12, %v281_v25, %v131_v5 }
  0x64   :  { %v136_v33 = vsel %vm129_vm13, %v132_v31, %v135_v29  ;;  %v239_v34 = vsel %vm232_vm14, %v235_v32, %v238_v30 }
  0x65   :  { %v137_v35 = vsel %vm126_vm15, nan, %v136_v33  ;;  %v240_v36 = vsel %vm126_vm15, nan, %v239_v34 }
  0x66   :  { %v241_v37 = vsel %vm28_vm0, %v240_v36, %v137_v35 }
  0x67   :  { %242 = vst [vmem:[#allocation5] sm:$0xff] %v241_v37 }
  0x68   :  { %317 = shalt.err (!%p314_p12)
}
  0x69   :  { %s318_s24 = scalar_lea.hbm %s398_s1, 128 }
  0x6a   :  { %p319_p13 = scmp.ne.s32.totalorder %s398_s1, %s318_s24  ;;  %p322_p0 = scmp.lt.u32.totalorder %s318_s24, %s398_s1 }
  0x6c   :  { %p324_p1 = pnand %p322_p0, %p319_p13 }
  0x6e   :  { %327 = shalt.err (!%p324_p1)
}
  0x6f   :  { %252 = dma.vmem_to_hbm [thread:$0]  %s250_s20, 128, %s398_s1, [#allocation4]  }
  0x70   :  { %330 = dma.done.wait [#allocation4], 128  }
  0x71   :  { %331 = vsyncadd [#allocation4], 4294967168 }
  0x72   :  { %256 = vsyncpa [#allocation3], 1 }
  0x73   :  { %257 = vsyncpa [#allocation4], 1 }

</bundles_post_ra>
